<compile_context>
chip_gen: v5e
topology: v5e:2x2
jax: 0.10.0
libtpu: 0.0.40
codegen_flags: <defaults>
</compile_context>

<pallas_src>
import functools

import jax
import jax.numpy as jnp
from jax.experimental import pallas as pl
from jax.experimental.pallas import tpu as pltpu


def _round_up(x, m):
    return ((x + m - 1) // m) * m


def _kmeans_loss_kernel(f_ref, c_ref, cn2_ref, o_ref, *, n_true, tile_n):
    # f_ref:   [TILE_N, D]   feature tile (input dtype, fed straight to the MXU)
    # c_ref:   [K_pad, D]    centers, resident across the grid
    # cn2_ref: [1, K_pad]    f32 squared center norms (sentinel 4e12 on padding)
    # o_ref:   [TILE_N, 1]   f32 per-row min distance (0 for padded rows)
    f = f_ref[...]
    c = c_ref[...]

    # f @ c.T on the MXU; contraction over D without materializing a transpose.
    fc = jax.lax.dot_general(
        f, c,
        dimension_numbers=(((1,), (1,)), ((), ())),
        preferred_element_type=jnp.float32,
    )                                                   # [TILE_N, K_pad]

    f32 = f.astype(jnp.float32)
    f_n2 = jnp.sum(f32 * f32, axis=1, keepdims=True)    # [TILE_N, 1]

    # ||f||^2 + ||c||^2 - 2 f.c  (padded centers carry a >=1e12 sentinel norm)
    d2 = f_n2 + cn2_ref[...] - 2.0 * fc                 # [TILE_N, K_pad]

    # min over centers first, sqrt once per row.  Clamp at 1e12 == (1e6)^2 to
    # reproduce the PyTorch initial min_distance = 1e6; clamp at 0 to avoid
    # NaNs from fp cancellation in the matmul identity.
    min_d2 = jnp.min(d2, axis=1, keepdims=True)         # [TILE_N, 1]
    min_d = jnp.sqrt(jnp.clip(min_d2, 0.0, 1.0e12))

    # Mask feature rows that are padding (N was rounded up to TILE_N multiple).
    row = (pl.program_id(0) * tile_n
           + jax.lax.broadcasted_iota(jnp.int32, (tile_n, 1), 0))
    o_ref[...] = jnp.where(row < n_true, min_d, jnp.float32(0.0))


def kmeans_loss(features, centers, *, tile_n=None):
    """features: [N, D], centers: [K, D]  ->  scalar float32 loss."""
    n, d = features.shape
    k, d_c = centers.shape
    assert d == d_c, "feature dim mismatch"

    if tile_n is None:
        # Keep tiny inputs tiny; cap the tile so double-buffered feature tiles
        # stay well inside v7x's 64 MiB VMEM even for large D.
        tile_n = min(256, _round_up(n, 8))
    n_pad = _round_up(n, tile_n)
    k_pad = _round_up(k, 128)  # lane-dense d2 / MXU output (128-lane fill)

    f_p = jnp.pad(features, ((0, n_pad - n), (0, 0)))
    c_p = jnp.pad(centers, ((0, k_pad - k), (0, 0)))

    # Squared center norms, hoisted out of the N-loop (loop invariant).
    # Padded centers get a sentinel >= 1e12 so they can never win the min
    # (and if they did, the 1e12 clamp reproduces PyTorch's 1e6 init anyway).
    c32 = centers.astype(jnp.float32)
    c_n2 = jnp.sum(c32 * c32, axis=1)
    c_n2 = jnp.pad(c_n2, (0, k_pad - k), constant_values=4.0e12)
    c_n2 = c_n2.reshape(1, k_pad)

    num_tiles = n_pad // tile_n
    kernel = functools.partial(_kmeans_loss_kernel, n_true=n, tile_n=tile_n)

    per_row = pl.pallas_call(
        kernel,
        out_shape=jax.ShapeDtypeStruct((n_pad, 1), jnp.float32),
        grid=(num_tiles,),
        in_specs=[
            pl.BlockSpec((tile_n, d), lambda i: (i, 0)),   # feature tiles
            pl.BlockSpec((k_pad, d), lambda i: (0, 0)),    # centers, resident
            pl.BlockSpec((1, k_pad), lambda i: (0, 0)),    # center norms
        ],
        out_specs=pl.BlockSpec((tile_n, 1), lambda i: (i, 0)),
        compiler_params=pltpu.CompilerParams(
            dimension_semantics=("parallel",),
        ),
    )(f_p, c_p, c_n2)

    return jnp.sum(per_row) / jnp.float32(n)


def _reference(features, centers):
    diff = features[:, None, :] - centers[None, :, :]
    d = jnp.sqrt(jnp.sum(diff * diff, axis=-1))
    return jnp.mean(jnp.minimum(jnp.min(d, axis=-1), 1e6))


if __name__ == "__main__":
    key = jax.random.PRNGKey(0)
    k1, k2, k3, k4 = jax.random.split(key, 4)

    # Case 1: aligned small shapes (8 features, 4 centers, 128-dim embeddings).
    N, K, D = 8, 4, 128
    features = jax.random.normal(k1, (N, D), dtype=jnp.float32)
    centers = jax.random.normal(k2, (K, D), dtype=jnp.float32)
    loss = kmeans_loss(features, centers)
    jax.block_until_ready(loss)
    ref = _reference(features, centers)
    assert jnp.allclose(loss, ref, rtol=1e-4, atol=1e-4), (loss, ref)

    # Case 2: unaligned N / K to exercise the padding + masking paths.
    N2, K2 = 10, 3
    features2 = jax.random.normal(k3, (N2, D), dtype=jnp.float32)
    centers2 = jax.random.normal(k4, (K2, D), dtype=jnp.float32)
    loss2 = kmeans_loss(features2, centers2)
    jax.block_until_ready(loss2)
    ref2 = _reference(features2, centers2)
    assert jnp.allclose(loss2, ref2, rtol=1e-4, atol=1e-4), (loss2, ref2)

    print("KERNEL_OK")
</pallas_src>

<mosaic_0001>
module attributes {stable_mosaic.version = 11 : i64} {
  func.func @_kmeans_loss_kernel(%arg0: i32, %arg1: memref<8x128xf32, #tpu.memory_space<vmem>>, %arg2: memref<128x128xf32, #tpu.memory_space<vmem>>, %arg3: memref<1x128xf32, #tpu.memory_space<vmem>>, %arg4: memref<8x1xf32, #tpu.memory_space<vmem>>) attributes {dimension_semantics = [#tpu.dimension_semantics<parallel>], iteration_bounds = array<i64: 1>, scalar_prefetch = 0 : i64, scratch_operands = 0 : i64, tpu.core_type = #tpu.core_type<tc>, window_params = [{transform_indices = @transform_0, window_bounds = array<i64: 8, 128>}, {pipeline_mode = #tpu.pipeline_mode<synchronous>, transform_indices = @transform_1, window_bounds = array<i64: 128, 128>}, {pipeline_mode = #tpu.pipeline_mode<synchronous>, transform_indices = @transform_2, window_bounds = array<i64: 1, 128>}, {transform_indices = @transform_3, window_bounds = array<i64: 8, 1>}]} {
    %c0 = arith.constant 0 : index
    %c0_0 = arith.constant 0 : index
    %0 = vector.load %arg1[%c0, %c0_0] : memref<8x128xf32, #tpu.memory_space<vmem>>, vector<8x128xf32>
    %c0_1 = arith.constant 0 : index
    %c0_2 = arith.constant 0 : index
    %1 = vector.load %arg2[%c0_1, %c0_2] : memref<128x128xf32, #tpu.memory_space<vmem>>, vector<128x128xf32>
    %cst = arith.constant dense<0.000000e+00> : vector<8x128xf32>
    %2 = tpu.matmul %0, %1, %cst {dimension_numbers = #tpu.dot_dimension_numbers<[1], [1], [0], [0], [0, 0, 1, 0], [], []>} : vector<8x128xf32>, vector<128x128xf32>, vector<8x128xf32> -> vector<8x128xf32>
    %3 = arith.mulf %0, %0 : vector<8x128xf32>
    %cst_3 = arith.constant dense<0.000000e+00> : vector<8xf32>
    %4 = vector.multi_reduction <add>, %3, %cst_3 [1] : vector<8x128xf32> to vector<8xf32>
    %5 = vector.shape_cast %4 : vector<8xf32> to vector<8x1xf32>
    %c0_4 = arith.constant 0 : index
    %c0_5 = arith.constant 0 : index
    %6 = vector.load %arg3[%c0_4, %c0_5] : memref<1x128xf32, #tpu.memory_space<vmem>>, vector<1x128xf32>
    %7 = vector.broadcast %5 : vector<8x1xf32> to vector<8x128xf32>
    %8 = vector.broadcast %6 : vector<1x128xf32> to vector<8x128xf32>
    %9 = arith.addf %7, %8 : vector<8x128xf32>
    %cst_6 = arith.constant 2.000000e+00 : f32
    %10 = vector.broadcast %cst_6 : f32 to vector<8x128xf32>
    %11 = arith.mulf %10, %2 : vector<8x128xf32>
    %12 = arith.subf %9, %11 : vector<8x128xf32>
    %cst_7 = arith.constant dense<0x7F800000> : vector<8xf32>
    %13 = vector.multi_reduction <minimumf>, %12, %cst_7 [1] : vector<8x128xf32> to vector<8xf32>
    %14 = vector.shape_cast %13 : vector<8xf32> to vector<8x1xf32>
    %cst_8 = arith.constant 0.000000e+00 : f32
    %cst_9 = arith.constant 9.99999995E+11 : f32
    %15 = vector.broadcast %cst_8 : f32 to vector<8x1xf32>
    %16 = arith.maximumf %15, %14 : vector<8x1xf32>
    %17 = vector.broadcast %cst_9 : f32 to vector<8x1xf32>
    %18 = arith.minimumf %17, %16 : vector<8x1xf32>
    %19 = math.sqrt %18 : vector<8x1xf32>
    %c8_i32 = arith.constant 8 : i32
    %20 = arith.muli %arg0, %c8_i32 : i32
    %21 = tpu.iota {dimensions = array<i32: 0>} : vector<8x1xi32>
    %22 = vector.broadcast %20 : i32 to vector<8x1xi32>
    %23 = arith.addi %22, %21 : vector<8x1xi32>
    %c8_i32_10 = arith.constant 8 : i32
    %24 = vector.broadcast %c8_i32_10 : i32 to vector<8x1xi32>
    %25 = arith.cmpi slt, %23, %24 : vector<8x1xi32>
    %cst_11 = arith.constant 0.000000e+00 : f32
    %26 = vector.broadcast %cst_11 : f32 to vector<8x1xf32>
    %27 = arith.select %25, %19, %26 : vector<8x1xi1>, vector<8x1xf32>
    %c0_12 = arith.constant 0 : index
    %c0_13 = arith.constant 0 : index
    %28 = vector.load %arg4[%c0_12, %c0_13] : memref<8x1xf32, #tpu.memory_space<vmem>>, vector<8x1xf32>
    tpu.vector_store %arg4[%c0_12, %c0_13], %27 {strides = array<i32>} : memref<8x1xf32, #tpu.memory_space<vmem>>, vector<8x1xf32>,
    return
  }
  func.func @transform_0(%arg0: i32) -> (i32, i32) {
    %c0_i32 = arith.constant 0 : i32
    %c0_i32_0 = arith.constant 0 : i32
    return %arg0, %c0_i32 : i32, i32
  }
  func.func @transform_1(%arg0: i32) -> (i32, i32) {
    %c0_i32 = arith.constant 0 : i32
    %c0_i32_0 = arith.constant 0 : i32
    %c0_i32_1 = arith.constant 0 : i32
    return %c0_i32, %c0_i32_0 : i32, i32
  }
  func.func @transform_2(%arg0: i32) -> (i32, i32) {
    %c0_i32 = arith.constant 0 : i32
    %c0_i32_0 = arith.constant 0 : i32
    %c0_i32_1 = arith.constant 0 : i32
    return %c0_i32, %c0_i32_0 : i32, i32
  }
  func.func @transform_3(%arg0: i32) -> (i32, i32) {
    %c0_i32 = arith.constant 0 : i32
    %c0_i32_0 = arith.constant 0 : i32
    return %arg0, %c0_i32 : i32, i32
  }
}

</mosaic_0001>

<bundles_post_ra>
// kernel: tpu_custom_call.1
= control target key start
LH: loop header
LB: loop body
LE: loop exit
PB: predicated region body
PF: predicated region fallthrough
CT: control target
= control target key end

     0   :  { %8 = vsyncpa [#allocation3], 0  ;;  %s217_s0 = inlined_call_operand.hbm [shape: f32[8,128], index: 0, kind: input, shape index: {}]   ;;  %s218_s1 = inlined_call_operand.hbm [shape: f32[128,128], index: 1, kind: input, shape index: {}]   ;;  %s219_s2 = inlined_call_operand.vmem [shape: f32[1,128], index: 2, kind: input, shape index: {}]   ;;  %s220_s3 = inlined_call_operand.vmem [shape: f32[8,1], index: 3, kind: output, shape index: {}]  }
   0x1   :  { %s15_s14 = sshll.u32 %s217_s0, 4  ;;  %s16_s14 = int_to_ptr.hbm [resolvable:$true] %s15_s14 }
   0x2   :  { %9 = vsyncpa [#allocation5], 0  ;;  %s181_s15 = smov [#allocation2]   ;;  %s25_s19 = sshll.u32 %s218_s1, 4  ;;  %s26_s19 = int_to_ptr.hbm [resolvable:$true] %s25_s19 }
   0x3   :  { %s17_s16 = sshll.u32 %s181_s15, 4  ;;  %s182_s20 = smov [#allocation4]   ;;  %s18_s16 = int_to_ptr.vmem [resolvable:$true] %s17_s16 }
   0x4   :  { %20 = dma.hbm_to_vmem [thread:$0]  %s16_s14, 128, %s18_s16, [#allocation3]  }
   0x5   :  { %s27_s21 = sshll.u32 %s182_s20, 4  ;;  %s183_s22 = smov 128   ;;  %s28_s21 = int_to_ptr.vmem [resolvable:$true] %s27_s21 }
   0x6   :  { %s184_s23 = smov 8  }
   0x7   :  { %33 = dma.hbm_to_vmem [thread:$0]  %s26_s19, 2048, %s28_s21, [#allocation5], %s183_s22, %s183_s22, %s184_s23  }
   0x8   :  { %177 = dma.done.wait [#allocation3], 128  }
   0x9   :  { %178 = vsyncadd [#allocation3], 4294967168 }
   0xa   :  { %179 = dma.done.wait [#allocation5], 2048  }
   0xb   :  { %180 = vsyncadd [#allocation5], 4294965248  ;;  %v60_v0 = vld [vmem:[#allocation4 + $0x78] sm:$0xff]  ;;  %v59_v1 = vld [vmem:[#allocation4 + $0x70] sm:$0xff]  ;;  %vm114_vm0 = vcmask 7168  }
   0xc   :  { %61 = vmatpush.xpose.msra.mxu0 %v60_v0  ;;  %v58_v2 = vld [vmem:[#allocation4 + $0x68] sm:$0xff]  ;;  %v57_v3 = vld [vmem:[#allocation4 + $0x60] sm:$0xff]  ;;  %v56_v4 = vld [vmem:[#allocation4 + $0x58] sm:$0xff] }
   0xd   :  { %v55_v5 = vld [vmem:[#allocation4 + $0x50] sm:$0xff]  ;;  %v54_v6 = vld [vmem:[#allocation4 + $0x48] sm:$0xff]  ;;  %v53_v7 = vld [vmem:[#allocation4 + $0x40] sm:$0xff] }
   0xe   :  { %v52_v8 = vld [vmem:[#allocation4 + $0x38] sm:$0xff]  ;;  %v51_v11 = vld [vmem:[#allocation4 + $0x30] sm:$0xff]  ;;  %v50_v12 = vld [vmem:[#allocation4 + $0x28] sm:$0xff] }
   0xf   :  { %v44_v9 = vld [vmem:[#allocation2] sm:$0xff]  ;;  %v49_v13 = vld [vmem:[#allocation4 + $0x20] sm:$0xff]  ;;  %v47_v15 = vld [vmem:[#allocation4 + $0x10] sm:$0xff] }
  0x10   :  { %62 = vmatpush.xpose.msra.mxu0 %v59_v1  ;;  %v81_v10 = vmul.f32 %v44_v9, %v44_v9  ;;  %v48_v14 = vld [vmem:[#allocation4 + $0x18] sm:$0xff]  ;;  %v46_v16 = vld [vmem:[#allocation4 + $0x8] sm:$0xff]  ;;  %v45_v17 = vld [vmem:[#allocation4] sm:$0xff] }
  0x11   :  { %v126_v18 = vld [vmem:[%s219_s2] ss:$0 sm:$0xff] }
  0x12   :  { %82 = vadd.xlane.f32.xlu0 %v81_v10 }
  0x14   :  { %63 = vmatpush.xpose.msra.mxu0 %v58_v2 }
  0x18   :  { %64 = vmatpush.xpose.msra.mxu0 %v57_v3 }
  0x1c   :  { %65 = vmatpush.xpose.msra.mxu0 %v56_v4 }
  0x20   :  { %66 = vmatpush.xpose.msra.mxu0 %v55_v5 }
  0x24   :  { %67 = vmatpush.xpose.msra.mxu0 %v54_v6 }
  0x28   :  { %68 = vmatpush.xpose.msra.mxu0 %v53_v7 }
  0x2c   :  { %69 = vmatpush.xpose.msra.mxu0 %v52_v8 }
  0x30   :  { %70 = vmatpush.xpose.msra.mxu0 %v51_v11 }
  0x34   :  { %71 = vmatpush.xpose.msra.mxu0 %v50_v12 }
  0x38   :  { %72 = vmatpush.xpose.msra.mxu0 %v49_v13 }
  0x3c   :  { %73 = vmatpush.xpose.msra.mxu0 %v48_v14 }
  0x40   :  { %74 = vmatpush.xpose.msra.mxu0 %v47_v15 }
  0x44   :  { %75 = vmatpush.xpose.msra.mxu0 %v46_v16 }
  0x48   :  { %76 = vmatpush.xpose.msra.mxu0 %v45_v17 }
  0x4b   :  { %77 = vmatmul.f32.vlgmr.msra.gmra.mxu0 %v44_v9 }
  0x85   :  { %v83_v19 = vpop.xlane.xlu0 %82 }
  0x86   :  { %v88_v20 = vadd.f32 %v126_v18, %v83_v19 }
  0xc8   :  { %v78_v21 = vpop.f32.mrf.mxu0 }
  0xc9   :  { %v89_v22 = vmul.f32 2.0, %v78_v21 }
  0xcb   :  { %v90_v23 = vsub.f32 %v88_v20, %v89_v22 }
  0xcd   :  { %91 = vmin.xlane.f32.xlu0 %v90_v23 }
 0x140   :  { %v92_v24 = vpop.xlane.xlu0 %91 }
 0x141   :  { %v93_v25 = vmax.f32 %v92_v24, 0.0 }
 0x143   :  { %v94_v26 = vmin.f32 %v93_v25, 1e+12 }
 0x145   :  { %127 = vrsqrt.f32 %v94_v26  ;;  %vm102_vm1 = vcmp.eq.f32.partialorder %v94_v26, inf  ;;  %v105_v34 = vand.u32 2147483648, %v94_v26  ;;  %vm104_vm2 = vcmp.eq.f32.partialorder %v94_v26, 0.0 }
 0x14b   :  { %v128_v27 = vpop.eup %127 }
 0x14c   :  { %v96_v28 = vmul.f32 %v128_v27, %v94_v26 }
 0x14e   :  { %v97_v29 = vmul.f32 %v128_v27, %v96_v28 }
 0x150   :  { %v98_v30 = vmul.f32 0.5, %v97_v29 }
 0x152   :  { %v99_v31 = vsub.f32 1.5, %v98_v30 }
 0x154   :  { %v100_v32 = vmul.f32 %v128_v27, %v99_v31 }
 0x156   :  { %v101_v33 = vmul.f32 %v100_v32, %v94_v26 }
 0x158   :  { %v103_v35 = vsel %vm102_vm1, %v94_v26, %v101_v33 }
 0x159   :  { %v106_v36 = vsel %vm104_vm2, %v105_v34, %v103_v35 }
 0x15a   :  { %115 = vst.msk [vmem:[%s220_s3] sm:$0xff] %vm114_vm0, %v106_v36 }
 0x15b   :  { %120 = vsyncpa [#allocation3], 1 }
 0x15c   :  { %121 = vsyncpa [#allocation5], 1 }

</bundles_post_ra>
